<compile_context>
chip_gen: v7x
topology: tpu7x:2x2x1
jax: 0.10.0
libtpu: 0.0.40
codegen_flags: <defaults>
</compile_context>

<pallas_src>
import functools

import jax
import jax.numpy as jnp
from jax import lax
from jax.experimental import pallas as pl
from jax.experimental.pallas import tpu as pltpu


# --------------------------------------------------------------------------- #
# small helpers
# --------------------------------------------------------------------------- #

def _vmem_capacity_bytes():
    try:
        return int(pltpu.get_tpu_info().vmem_capacity_bytes)
    except Exception:
        return 64 * 1024 * 1024          # conservative default (v7x per-core VMEM)


def _pick_seq_tile(S, max_tile=8192):
    """Tile length along a flattened-voxel axis: a multiple of 8 that divides S
    (or S itself when small / no such divisor) and is <= max_tile."""
    if S <= max_tile:
        return S
    best = None
    for d in range(8, max_tile + 1, 8):
        if S % d == 0:
            best = d
    return best if best is not None else S


def _up2_hw(y):
    """Nearest 2x upsample of the inner spatial dims: (Z,H,W,C) -> (Z,2H,2W,C)."""
    Z, H, W, C = y.shape
    y = jnp.broadcast_to(y[:, :, :, None, :], (Z, H, W, 2, C)).reshape(Z, H, 2 * W, C)
    y = jnp.broadcast_to(y[:, :, None, :, :], (Z, H, 2, 2 * W, C)).reshape(Z, 2 * H, 2 * W, C)
    return y


def _up2_z(y):
    """Nearest 2x upsample of the leading (z) dim."""
    Z = y.shape[0]
    return jnp.broadcast_to(y[:, None], (Z, 2) + y.shape[1:]).reshape((2 * Z,) + y.shape[1:])


# --------------------------------------------------------------------------- #
# GroupNorm: per-tile (sum, sum_sq) partial reductions  +  tiny finalize
# --------------------------------------------------------------------------- #

def _gn_partials_kernel(x_ref, p_ref):
    x = x_ref[0].astype(jnp.float32)                       # (TS, C)
    s1 = jnp.sum(x, axis=0, keepdims=True)
    s2 = jnp.sum(x * x, axis=0, keepdims=True)
    p_ref[0, 0] = jnp.concatenate([s1, s2], axis=0)        # (2, C)


def gn_partials(x_flat, max_tile=8192):
    """x_flat: [N, S, C] -> per-tile (sum, sum_sq) partials [N, T, 2, C] (f32)."""
    N, S, C = x_flat.shape
    TS = _pick_seq_tile(S, max_tile)
    T = S // TS
    return pl.pallas_call(
        _gn_partials_kernel,
        out_shape=jax.ShapeDtypeStruct((N, T, 2, C), jnp.float32),
        grid=(N, T),
        in_specs=[pl.BlockSpec((1, TS, C), lambda n, t: (n, t, 0))],
        out_specs=pl.BlockSpec((1, 1, 2, C), lambda n, t: (n, t, 0, 0)),
        compiler_params=pltpu.CompilerParams(
            dimension_semantics=("parallel", "parallel")),
    )(x_flat)


def gn_affine_from_partials(p, gamma, beta, num_groups, count, eps=1e-5):
    """partials [N,T,2,C] -> per-channel affine [N,2,C] with GN(x) = a*x + b.

    Uses the one-pass (sum, sum_sq) formula (biased variance, matching PyTorch
    GroupNorm); partials are accumulated in f32.  Tiny arrays -> plain jnp.
    """
    N, _, _, C = p.shape
    G = num_groups
    cg = C // G
    s = jnp.sum(p, axis=1)                                 # (N, 2, C)
    s1 = s[:, 0].reshape(N, G, cg).sum(-1)                 # (N, G)
    s2 = s[:, 1].reshape(N, G, cg).sum(-1)
    n = float(count * cg)
    mean = s1 / n
    var = jnp.maximum(s2 / n - mean * mean, 0.0)
    inv = lax.rsqrt(var + eps)
    mean_c = jnp.repeat(mean, cg, axis=1)                  # (N, C)
    inv_c = jnp.repeat(inv, cg, axis=1)
    a = inv_c * gamma[None, :]
    b = beta[None, :] - mean_c * a
    return jnp.stack([a, b], axis=1).astype(jnp.float32)   # (N, 2, C)


# --------------------------------------------------------------------------- #
# Fused  GN+SiLU (+2x subdivide) prologue -> 3x3x3 conv -> +bias [+skip] epilogue
# --------------------------------------------------------------------------- #

def _conv3x3_kernel(xc_ref, xp_ref, xn_ref, ab_ref, w_ref, b_ref, *rest,
                    upsample, with_skip, emit_partials):
    """Grid = (N, DT).   One z-slab of the high-res output per step.

    xc_ref : (1, TDl, H, W, Cin) low-res slab   (upsample)      -- or --
             (1, TD2, H2, W2, Cin) high-res slab (no upsample)
    xp/xn  : (1, 1, H, W, Cin) clamped prev/next z-slice (halo)
    ab_ref : (1, 2, Cin)  GroupNorm affine
    w_ref  : (27, Cin, Cout) bf16 taps (kd*9 + kh*3 + kw)
    b_ref  : (1, Cout)
    skip   : (1, TDl, H2//2, W2//2, Cout) low-res residual       [optional]
    o_ref  : (1, TD2, H2, W2, Cout)
    p_ref  : (1, 1, 2, Cout) GN partials (sum, sum_sq)            [optional]
    xpad   : (TD2+2, H2+2, W2+2, Cin) bf16 VMEM scratch (padded slab)
    """
    i = 0
    skip_ref = None
    if with_skip:
        skip_ref = rest[i]
        i += 1
    o_ref = rest[i]
    i += 1
    p_ref = None
    if emit_partials:
        p_ref = rest[i]
        i += 1
    xpad_ref = rest[i]

    dt = pl.program_id(1)
    nt = pl.num_programs(1)

    _, TD2, H2, W2, Cout = o_ref.shape
    Cin = xc_ref.shape[-1]
    M = TD2 * H2 * W2

    ab = ab_ref[0].astype(jnp.float32)                     # (2, Cin)
    ga = ab[0].reshape(1, 1, 1, Cin)
    gb = ab[1].reshape(1, 1, 1, Cin)

    def act(v):
        # GroupNorm affine + SiLU (exp + approx reciprocal -> EUP), f32 -> bf16.
        v = v.astype(jnp.float32) * ga + gb
        v = v * pl.reciprocal(1.0 + jnp.exp(-v), approx=True)
        return v.astype(xpad_ref.dtype)

    # ---- build padded slab: zero rim, normalised (+2x upsampled) interior ---- #
    xpad_ref[...] = jnp.zeros(xpad_ref.shape, xpad_ref.dtype)

    center = act(xc_ref[0])
    if upsample:
        center = _up2_z(_up2_hw(center))                   # (TD2, H2, W2, Cin)
    xpad_ref[pl.ds(1, TD2), pl.ds(1, H2), pl.ds(1, W2), :] = center

    @pl.when(dt > 0)
    def _():
        lo = act(xp_ref[0])                                # (1, H?, W?, Cin)
        if upsample:
            lo = _up2_hw(lo)
        xpad_ref[pl.ds(0, 1), pl.ds(1, H2), pl.ds(1, W2), :] = lo

    @pl.when(dt < nt - 1)
    def _():
        hi = act(xn_ref[0])
        if upsample:
            hi = _up2_hw(hi)
        xpad_ref[pl.ds(TD2 + 1, 1), pl.ds(1, H2), pl.ds(1, W2), :] = hi

    # ---- 27 shifted bf16 MXU matmuls, single f32 accumulation chain ---------- #
    acc = None
    for kd in range(3):
        for kh in range(3):
            for kw in range(3):
                lhs = xpad_ref[pl.ds(kd, TD2), pl.ds(kh, H2), pl.ds(kw, W2), :]
                lhs = lhs.reshape(M, Cin)
                c = jnp.dot(lhs, w_ref[kd * 9 + kh * 3 + kw],
                            preferred_element_type=jnp.float32)
                acc = c if acc is None else acc + c

    out = acc + b_ref[...].astype(jnp.float32)             # (M, Cout)

    if with_skip:
        s = skip_ref[0].astype(jnp.float32)                # low-res (TDl, H, W, Cout)
        out = out + _up2_z(_up2_hw(s)).reshape(M, Cout)

    if emit_partials:
        s1 = jnp.sum(out, axis=0, keepdims=True)
        s2 = jnp.sum(out * out, axis=0, keepdims=True)
        p_ref[0, 0] = jnp.concatenate([s1, s2], axis=0)    # (2, Cout)

    # TODO(synk): lane-dense output store (W2*Cout last dim) would need a
    #   sublane->lane repack of `out`; kept simple here (Cout=64 masked stores).
    o_ref[...] = out.reshape(1, TD2, H2, W2, Cout).astype(o_ref.dtype)


def _pick_td2(D2, H2, W2, cin, cout, in_bytes, out_bytes, upsample, with_skip,
              budget, max_td=8):
    """Largest even divisor TD2 of D2 (<= max_td) whose per-tile VMEM estimate
    fits the budget (falls back to 2)."""
    best = 2
    for td2 in range(2, min(max_td, D2) + 1, 2):
        if D2 % td2:
            continue
        tdl = td2 // 2
        hl, wl = H2 // 2, W2 // 2
        xpad = (td2 + 2) * (H2 + 2) * (W2 + 2) * cin * 2
        if upsample:
            cen, halo = tdl * hl * wl * cin * in_bytes, hl * wl * cin * in_bytes
            up_tmp = td2 * H2 * W2 * cin * 2
        else:
            cen, halo = td2 * H2 * W2 * cin * in_bytes, H2 * W2 * cin * in_bytes
            up_tmp = 0
        skp = tdl * hl * wl * cout * 4 if with_skip else 0
        outb = td2 * H2 * W2 * cout * out_bytes
        accb = 2 * td2 * H2 * W2 * cout * 4                # dot-chain f32 temporaries
        wgt = 27 * cin * cout * 2
        est = xpad + up_tmp + accb + 2 * (cen + 2 * halo + skp + outb + wgt) + (1 << 20)
        if est <= budget:
            best = td2
    return best


def conv3x3_fused(x, ab, w, b, *, skip=None, upsample, out_dtype,
                  emit_partials=False, max_td=8):
    """GN-affine+SiLU prologue -> [2x nearest subdivide ->] 3^3 conv (pad 1)
    -> +bias [+ 2x-broadcast low-res skip] epilogue, z-slab/halo tiled.

    x   : [N, D, H, W, Cin]  (low-res if upsample else high-res)
    ab  : [N, 2, Cin],  w: [3,3,3,Cin,Cout],  b: [Cout]
    skip: [N, D2//2, H2//2, W2//2, Cout] low-res residual, or None
    -> out [N, D2, H2, W2, Cout]  (+ GN partials [N, DT, 2, Cout] if requested)
    """
    N, Dz, Hy, Wx, Cin = x.shape
    Cout = w.shape[-1]
    if upsample:
        D2, H2, W2 = 2 * Dz, 2 * Hy, 2 * Wx
    else:
        D2, H2, W2 = Dz, Hy, Wx

    cap = _vmem_capacity_bytes()
    TD2 = _pick_td2(D2, H2, W2, Cin, Cout,
                    jnp.dtype(x.dtype).itemsize, jnp.dtype(out_dtype).itemsize,
                    upsample, skip is not None,
                    budget=int(cap * 0.4), max_td=max_td)
    TDl = TD2 // 2
    DT = D2 // TD2

    wf = w.reshape(27, Cin, Cout).astype(jnp.bfloat16)

    if upsample:
        cz, ch, cw, stepz, zmax = TDl, Hy, Wx, TDl, Dz - 1
    else:
        cz, ch, cw, stepz, zmax = TD2, H2, W2, TD2, D2 - 1

    in_specs = [
        pl.BlockSpec((1, cz, ch, cw, Cin), lambda n, t: (n, t, 0, 0, 0)),
        pl.BlockSpec((1, 1, ch, cw, Cin),
                     lambda n, t: (n, jnp.maximum(t * stepz - 1, 0), 0, 0, 0)),
        pl.BlockSpec((1, 1, ch, cw, Cin),
                     lambda n, t: (n, jnp.minimum((t + 1) * stepz, zmax), 0, 0, 0)),
        pl.BlockSpec((1, 2, Cin), lambda n, t: (n, 0, 0)),
        pl.BlockSpec((27, Cin, Cout), lambda n, t: (0, 0, 0)),
        pl.BlockSpec((1, Cout), lambda n, t: (0, 0)),
    ]
    args = [x, x, x, ab, wf, b.reshape(1, Cout)]
    if skip is not None:
        in_specs.append(pl.BlockSpec((1, TDl, H2 // 2, W2 // 2, Cout),
                                     lambda n, t: (n, t, 0, 0, 0)))
        args.append(skip)

    out_shapes = [jax.ShapeDtypeStruct((N, D2, H2, W2, Cout), out_dtype)]
    out_specs = [pl.BlockSpec((1, TD2, H2, W2, Cout), lambda n, t: (n, t, 0, 0, 0))]
    if emit_partials:
        out_shapes.append(jax.ShapeDtypeStruct((N, DT, 2, Cout), jnp.float32))
        out_specs.append(pl.BlockSpec((1, 1, 2, Cout), lambda n, t: (n, t, 0, 0)))

    kernel = functools.partial(_conv3x3_kernel, upsample=upsample,
                               with_skip=skip is not None,
                               emit_partials=emit_partials)
    res = pl.pallas_call(
        kernel,
        out_shape=tuple(out_shapes),
        grid=(N, DT),
        in_specs=in_specs,
        out_specs=tuple(out_specs),
        scratch_shapes=[pltpu.VMEM((TD2 + 2, H2 + 2, W2 + 2, Cin), jnp.bfloat16)],
        compiler_params=pltpu.CompilerParams(
            dimension_semantics=("parallel", "parallel"),
            vmem_limit_bytes=int(cap * 3 // 4)),
    )(*args)
    if emit_partials:
        return res[0], res[1]
    return res[0]


# --------------------------------------------------------------------------- #
# 1x1x1 skip projection, evaluated at LOW resolution
# --------------------------------------------------------------------------- #

def _skip_proj_kernel(x_ref, w_ref, b_ref, o_ref):
    y = jnp.dot(x_ref[0].astype(jnp.bfloat16), w_ref[...],
                preferred_element_type=jnp.float32)
    o_ref[0] = (y + b_ref[...].astype(jnp.float32)).astype(o_ref.dtype)


def skip_proj(x_flat, w, b, max_tile=8192):
    """1x1x1 conv at low resolution: [N, S, Cin] -> [N, S, Cout]."""
    N, S, Cin = x_flat.shape
    Cout = w.shape[-1]
    TS = _pick_seq_tile(S, max_tile)
    T = S // TS
    return pl.pallas_call(
        _skip_proj_kernel,
        out_shape=jax.ShapeDtypeStruct((N, S, Cout), x_flat.dtype),
        grid=(N, T),
        in_specs=[pl.BlockSpec((1, TS, Cin), lambda n, t: (n, t, 0)),
                  pl.BlockSpec((Cin, Cout), lambda n, t: (0, 0)),
                  pl.BlockSpec((1, Cout), lambda n, t: (0, 0))],
        out_specs=pl.BlockSpec((1, TS, Cout), lambda n, t: (n, t, 0)),
        compiler_params=pltpu.CompilerParams(
            dimension_semantics=("parallel", "parallel")),
    )(x_flat, w.astype(jnp.bfloat16), b.reshape(1, Cout))


# ------------------------------- Module wrapper ----------------------------- #

class SparseSubdivideBlock3dPallas:
    def __init__(self, channels, resolution, out_channels=None, num_groups=32,
                 key=jax.random.PRNGKey(0)):
        self.channels = channels
        self.resolution = resolution
        self.out_resolution = resolution * 2
        self.out_channels = out_channels or channels
        self.num_groups = num_groups
        Ci, Co = channels, self.out_channels

        k1, k2, k3, k4 = jax.random.split(key, 4)
        # GroupNorm params (PyTorch default init: weight=1, bias=0)
        self.gn1_g = jnp.ones((Ci,), jnp.float32)
        self.gn1_b = jnp.zeros((Ci,), jnp.float32)
        self.gn2_g = jnp.ones((Co,), jnp.float32)
        self.gn2_b = jnp.zeros((Co,), jnp.float32)
        # out_layers conv #1: 3x3x3, Ci -> Co
        self.w1 = jax.random.normal(k1, (3, 3, 3, Ci, Co), jnp.float32) / jnp.sqrt(27.0 * Ci)
        self.b1 = 0.01 * jax.random.normal(k2, (Co,), jnp.float32)
        # out_layers conv #2: zero_module -> zero weights and bias
        self.w2 = jnp.zeros((3, 3, 3, Co, Co), jnp.float32)
        self.b2 = jnp.zeros((Co,), jnp.float32)
        # skip connection: 1x1x1 conv iff channel count changes, else identity
        if Co == Ci:
            self.skip_w = None
            self.skip_b = None
        else:
            self.skip_w = jax.random.normal(k3, (Ci, Co), jnp.float32) / jnp.sqrt(float(Ci))
            self.skip_b = 0.01 * jax.random.normal(k4, (Co,), jnp.float32)

    def __call__(self, x_ncdhw):
        # x_ncdhw: [N, C, D, H, W] (dense-equivalent sparse tensor, all active)
        x = jnp.transpose(x_ncdhw, (0, 2, 3, 4, 1))        # NDHWC, low resolution
        N, D, H, W, Ci = x.shape
        G, Co = self.num_groups, self.out_channels
        S = D * H * W
        D2, H2, W2 = 2 * D, 2 * H, 2 * W

        # (1) GN1 statistics on the LOW-res input (exact: the reference applies
        #     GroupNorm before SparseSubdivide) -> per-channel affine.
        ab1 = gn_affine_from_partials(gn_partials(x.reshape(N, S, Ci)),
                                      self.gn1_g, self.gn1_b, G, S)

        # (2) conv1 with fused GN1+SiLU + 2x nearest subdivide prologue; GN2
        #     (sum, sum_sq) partials come from its epilogue (no h1 re-read).
        #     h1 is carried in bf16 to halve the dominant HBM intermediate.
        h1, p2 = conv3x3_fused(x, ab1, self.w1, self.b1, skip=None,
                               upsample=True, out_dtype=jnp.bfloat16,
                               emit_partials=True)

        ab2 = gn_affine_from_partials(p2, self.gn2_g, self.gn2_b, G, D2 * H2 * W2)

        # (3) skip branch at LOW resolution (1x1x1 conv commutes with nearest
        #     upsample); identity case reuses x.  Broadcast 2x inside conv2.
        if Co == Ci:
            s_low = x
        else:
            s_low = skip_proj(x.reshape(N, S, Ci), self.skip_w, self.skip_b)
            s_low = s_low.reshape(N, D, H, W, Co)

        # (4) conv2 (zero-init) with fused GN2+SiLU prologue and fused skip add.
        out = conv3x3_fused(h1, ab2, self.w2, self.b2, skip=s_low,
                            upsample=False, out_dtype=jnp.float32,
                            emit_partials=False)
        return jnp.transpose(out, (0, 4, 1, 2, 3))         # back to NCDHW


if __name__ == "__main__":
    key = jax.random.PRNGKey(0)
    k_param, k_x = jax.random.split(key)

    channels, out_channels, num_groups, resolution = 32, 64, 32, 8
    N = 2

    block = SparseSubdivideBlock3dPallas(channels, resolution,
                                         out_channels=out_channels,
                                         num_groups=num_groups, key=k_param)
    x = jax.random.normal(
        k_x, (N, channels, resolution, resolution, resolution), jnp.float32)

    out = jax.block_until_ready(block(x))
    assert out.shape == (N, out_channels, 2 * resolution, 2 * resolution, 2 * resolution)
    assert out.dtype == jnp.float32
    assert bool(jnp.isfinite(out).all())

    # Light numerical check: conv #2 is zero-initialised (zero_module), so the
    # block output must equal the 2x nearest upsample of the 1x1x1 skip conv
    # (up to bf16 matmul rounding in the skip projection).
    x_l = jnp.transpose(x, (0, 2, 3, 4, 1)).reshape(N, resolution ** 3, channels)
    ref = x_l @ block.skip_w + block.skip_b
    ref = ref.reshape(N, resolution, resolution, resolution, out_channels)
    ref = jnp.repeat(jnp.repeat(jnp.repeat(ref, 2, axis=1), 2, axis=2), 2, axis=3)
    ref = jnp.transpose(ref, (0, 4, 1, 2, 3))
    err = float(jnp.max(jnp.abs(out - ref)))
    assert err < 0.1, f"skip-path mismatch: max abs err {err}"

    print("KERNEL_OK")
</pallas_src>

<mosaic_0001>
module attributes {stable_mosaic.version = 11 : i64} {
  func.func @_gn_partials_kernel(%arg0: i32, %arg1: i32, %arg2: memref<1x512x32xf32, #tpu.memory_space<vmem>>, %arg3: memref<1x1x2x32xf32, #tpu.memory_space<vmem>>) attributes {dimension_semantics = [#tpu.dimension_semantics<parallel>, #tpu.dimension_semantics<parallel>], iteration_bounds = array<i64: 2, 1>, scalar_prefetch = 0 : i64, scratch_operands = 0 : i64, tpu.core_type = #tpu.core_type<tc>, window_params = [{transform_indices = @transform_0, window_bounds = array<i64: 1, 512, 32>}, {transform_indices = @transform_1, window_bounds = array<i64: 1, 1, 2, 32>}]} {
    %c0 = arith.constant 0 : index
    %c0_0 = arith.constant 0 : index
    %c0_1 = arith.constant 0 : index
    %0 = vector.load %arg2[%c0, %c0_0, %c0_1] : memref<1x512x32xf32, #tpu.memory_space<vmem>>, vector<1x512x32xf32>
    %1 = vector.shape_cast %0 : vector<1x512x32xf32> to vector<512x32xf32>
    %cst = arith.constant dense<0.000000e+00> : vector<32xf32>
    %2 = vector.multi_reduction <add>, %1, %cst [0] : vector<512x32xf32> to vector<32xf32>
    %3 = vector.shape_cast %2 : vector<32xf32> to vector<1x32xf32>
    %4 = arith.mulf %1, %1 : vector<512x32xf32>
    %cst_2 = arith.constant dense<0.000000e+00> : vector<32xf32>
    %5 = vector.multi_reduction <add>, %4, %cst_2 [0] : vector<512x32xf32> to vector<32xf32>
    %6 = vector.shape_cast %5 : vector<32xf32> to vector<1x32xf32>
    %7 = tpu.concatenate %3, %6 in 0 : vector<1x32xf32>, vector<1x32xf32> -> vector<2x32xf32>
    %c0_3 = arith.constant 0 : index
    %c0_4 = arith.constant 0 : index
    %c0_5 = arith.constant 0 : index
    %c0_6 = arith.constant 0 : index
    %8 = vector.load %arg3[%c0_3, %c0_4, %c0_5, %c0_6] : memref<1x1x2x32xf32, #tpu.memory_space<vmem>>, vector<1x1x2x32xf32>
    %9 = vector.shape_cast %8 : vector<1x1x2x32xf32> to vector<2x32xf32>
    %10 = vector.shape_cast %7 : vector<2x32xf32> to vector<1x1x2x32xf32>
    tpu.vector_store %arg3[%c0_3, %c0_4, %c0_5, %c0_6], %10 {strides = array<i32>} : memref<1x1x2x32xf32, #tpu.memory_space<vmem>>, vector<1x1x2x32xf32>,
    return
  }
  func.func @transform_0(%arg0: i32, %arg1: i32) -> (i32, i32, i32) {
    %c0_i32 = arith.constant 0 : i32
    %c0_i32_0 = arith.constant 0 : i32
    return %arg0, %arg1, %c0_i32 : i32, i32, i32
  }
  func.func @transform_1(%arg0: i32, %arg1: i32) -> (i32, i32, i32, i32) {
    %c0_i32 = arith.constant 0 : i32
    %c0_i32_0 = arith.constant 0 : i32
    %c0_i32_1 = arith.constant 0 : i32
    return %arg0, %arg1, %c0_i32, %c0_i32_0 : i32, i32, i32, i32
  }
}

</mosaic_0001>

<bundles_post_ra>
// kernel: tpu_custom_call.1
= control target key start
LH: loop header
LB: loop body
LE: loop exit
PB: predicated region body
PF: predicated region fallthrough
CT: control target
= control target key end

     0   :  { %6 = vsyncpa [#allocation3], 0  ;;  %s1630_s0 = inlined_call_operand.vmem [shape: f32[2,512,32], index: 0, kind: input, shape index: {}]   ;;  %s1631_s1 = inlined_call_operand.hbm [shape: f32[2,1,2,32], index: 1, kind: output, shape index: {}]  }
   0x1   :  { %8 = vsyncpa [#allocation3 + $0x1], 0  ;;  %s792_s6 = smov 0   ;;  %s794_s7 = smov 0  }
   0x2   :  { %s796_s8 = smov 0   ;;  %s798_s9 = smov 0  }
   0x3   :  { %s800_s10 = smov 0   ;;  %s802_s11 = smov 0  }
   0x4 LB: > { %s633_s12 = sadd.s32 4294967295, %s779_s11   ;;  %s634_s13 = sadd.s32 4294967294, %s779_s11   ;;  %s779_s11 = sphi %s802_s11, %s14_s11   ;;  %s775_s10 = sphi %s800_s10, %s1764_s10   ;;  %s771_s9 = sphi %s798_s9, %s1763_s9   ;;  %s767_s8 = sphi %s796_s8, %s1762_s8   ;;  %s763_s7 = sphi %s794_s7, %s1761_s7   ;;  %s759_s6 = sphi %s792_s6, %s1760_s6  }
   0x5   : > { %s26_s14 = sadd.s32 1, %s775_s10  ;;  %s63_s15 = sadd.s32 1, %s767_s8 }
   0x6   : > { %p28_p0 = scmp.ge.s32.totalorder %s26_s14, 2  ;;  %p73_p1 = scmp.ne.s32.totalorder %s767_s8, %s763_s7 }
   0x7   : > { %p74_p2 = scmp.eq.s32.totalorder %s633_s12, 1  ;;  %p79_p3 = scmp.ne.s32.totalorder %s763_s7, %s759_s6 }
   0x8   : > { %s1766_s14 = smov (%p28_p0, %s26_s14), 0  ;;  %p80_p5 = scmp.eq.s32.totalorder %s634_s13, 1 }
   0x9   : > { %p832_p4 = por %p74_p2, %p73_p1  ;;  %s58_s17 = ssub.s32 %s775_s10, %s1766_s14 }
   0xa   : > { %p637_p6 = scmp.ge.s32.totalorder %s779_s11, 1  ;;  %p61_p7 = scmp.eq.s32.totalorder %s58_s17, 0 }
   0xb   : > { %p839_p8 = por %p80_p5, %p79_p3  ;;  %p111_p9 = scmp.lt.s32.totalorder %s779_s11, 3 }
   0xc   : > { %s845_s19 = scalar_select %p61_p7, %s767_s8, %s63_s15  }
   0xd   : > { %p112_p10 = pnand %p637_p6, %p111_p9 }
   0xf   : > { %115 = sbr.rel (%p112_p10) target bundleno = 219 (0xdb), region = 24 }
  0x16   : > { %p136_p11 = scmp.lt.s32.totalorder %s771_s9, 1  ;;  %vm209_vm0 = vcmask 261120   ;;  %s132_s25 = sand.u32 1, %s763_s7   ;;  %vm540_vm1 = vcmask 1040384   ;;  %vm542_vm2 = vcmask 254976  }
  0x17   : > { %s638_s26 = sshll.u32 %s132_s25, 1  ;;  %s642_s27 = sshll.u32 %s771_s9, 5 }
  0x18   : > { %s137_s20 = scalar_select %p136_p11, %s771_s9, 1 }
  0x19   : > { %s134_s28 = scalar_lea.vmem [#allocation2], %s638_s26  ;;  %s1583_s3 = scalar_lea.hbm %s1631_s1, %s642_s27 }
  0x1a   : > { %s645_s21 = sshll.u32 %s137_s20, 9  ;;  %s559_s29 = sshll.u32 %s134_s28, 4  ;;  %s1585_s29 = int_to_ptr.vmem [resolvable:$true] %s559_s29 }
  0x1b   : > { %s852_s24 = scalar_lea.vmem %s1630_s0, %s645_s21  ;;  %s545_s4 = scalar_lea.sflag [#allocation3], %s132_s25 }
  0x1c   : > { %v855_v0 = vld [vmem:[%s852_s24] sm:$0xff]  ;;  %v858_v1 = vld [vmem:[%s852_s24 + $0x8] sm:$0xff]  ;;  %v861_v2 = vld [vmem:[%s852_s24 + $0x10] sm:$0xff]  ;;  %s701_s5 = scalar_lea.vmem %s1585_s29, 32  ;;  %s781_s9 = smov [#allocation2]  }
  0x1d   : > { %v210_v3 = vsel %vm209_vm0, %v855_v0, 0.0  ;;  %v211_v4 = vsel %vm209_vm0, %v858_v1, 0.0  ;;  %v213_v5 = vsel %vm209_vm0, %v861_v2, 0.0  ;;  %v870_v6 = vld [vmem:[%s852_s24 + $0x18] sm:$0xff]  ;;  %v875_v9 = vld [vmem:[%s852_s24 + $0x20] sm:$0xff]  ;;  %v880_v12 = vld [vmem:[%s852_s24 + $0x28] sm:$0xff]  ;;  %p702_p12 = scmp.ne.s32.totalorder %s1585_s29, %s701_s5 }
  0x1e   : > { %v212_v7 = vadd.f32 %v211_v4, %v210_v3  ;;  %v215_v8 = vsel %vm209_vm0, %v870_v6, 0.0  ;;  %v217_v11 = vsel %vm209_vm0, %v875_v9, 0.0  ;;  %v219_v14 = vsel %vm209_vm0, %v880_v12, 0.0  ;;  %v885_v15 = vld [vmem:[%s852_s24 + $0x30] sm:$0xff]  ;;  %v888_v17 = vld [vmem:[%s852_s24 + $0x38] sm:$0xff]  ;;  %v891_v18 = vld [vmem:[%s852_s24 + $0x40] sm:$0xff] }
  0x1f   : > { %v221_v19 = vsel %vm209_vm0, %v885_v15, 0.0  ;;  %v896_v20 = vld [vmem:[%s852_s24 + $0x48] sm:$0xff]  ;;  %v899_v21 = vld [vmem:[%s852_s24 + $0x50] sm:$0xff]  ;;  %v902_v22 = vld [vmem:[%s852_s24 + $0x58] sm:$0xff]  ;;  %v223_v24 = vsel %vm209_vm0, %v888_v17, 0.0  ;;  %v225_v25 = vsel %vm209_vm0, %v891_v18, 0.0  ;;  %p703_p13 = pnand %p702_p12, %p832_p4 }
  0x20   : > { %v214_v10 = vadd.f32 %v213_v5, %v212_v7  ;;  %v909_v26 = vld [vmem:[%s852_s24 + $0x108] sm:$0xff]  ;;  %v912_v27 = vld [vmem:[%s852_s24 + $0x110] sm:$0xff]  ;;  %v915_v28 = vld [vmem:[%s852_s24 + $0x118] sm:$0xff]  ;;  %v227_v29 = vsel %vm209_vm0, %v896_v20, 0.0  ;;  %v229_v30 = vsel %vm209_vm0, %v899_v21, 0.0  ;;  %v923_v31 = vsel %vm209_vm0, %v902_v22, 0.0 }
  0x21   : > { %v926_v32 = vld [vmem:[%s852_s24 + $0x120] sm:$0xff]  ;;  %v929_v33 = vld [vmem:[%s852_s24 + $0x128] sm:$0xff]  ;;  %v932_v34 = vld [vmem:[%s852_s24 + $0x130] sm:$0xff]  ;;  %v936_v36 = vsel %vm209_vm0, %v909_v26, 0.0  ;;  %v940_v37 = vsel %vm209_vm0, %v912_v27, 0.0  ;;  %v944_v38 = vsel %vm209_vm0, %v915_v28, 0.0  ;;  %p704_p0 = pneg %p703_p13 }
  0x22   : > { %v216_v13 = vadd.f32 %v215_v8, %v214_v10  ;;  %1654 = vst [vmem:[#allocation5_spill] sm:$0xff] %v936_v36  ;;  %1655 = vst [vmem:[#allocation6_spill] sm:$0xff] %v940_v37  ;;  %v947_v39 = vld [vmem:[%s852_s24 + $0x138] sm:$0xff]  ;;  %v950_v40 = vld [vmem:[%s852_s24 + $0x140] sm:$0xff]  ;;  %v957_v42 = vsel %vm209_vm0, %v926_v32, 0.0  ;;  %v961_v43 = vsel %vm209_vm0, %v929_v33, 0.0  ;;  %v345_v36 = vmul.f32 %v861_v2, %v861_v2 }
  0x23   : > { %1656 = vst [vmem:[#allocation7_spill] sm:$0xff] %v944_v38  ;;  %v953_v41 = vld [vmem:[%s852_s24 + $0x148] sm:$0xff]  ;;  %1657 = vst [vmem:[#allocation8_spill] sm:$0xff] %v957_v42  ;;  %v965_v44 = vsel %vm209_vm0, %v932_v34, 0.0  ;;  %v968_v45 = vld [vmem:[%s852_s24 + $0x150] sm:$0xff]  ;;  %v978_v49 = vsel %vm209_vm0, %v947_v39, 0.0 }
  0x24   : > { %v218_v16 = vadd.f32 %v217_v11, %v216_v13  ;;  %1658 = vst [vmem:[#allocation9_spill] sm:$0xff] %v961_v43  ;;  %1659 = vst [vmem:[#allocation10_spill] sm:$0xff] %v965_v44  ;;  %v971_v46 = vld [vmem:[%s852_s24 + $0x158] sm:$0xff]  ;;  %v974_v47 = vld [vmem:[%s852_s24 + $0x160] sm:$0xff]  ;;  %v982_v50 = vsel %vm209_vm0, %v950_v40, 0.0  ;;  %v986_v51 = vsel %vm209_vm0, %v953_v41, 0.0 }
  0x25   : > { %1660 = vst [vmem:[#allocation11_spill] sm:$0xff] %v978_v49  ;;  %1661 = vst [vmem:[#allocation12_spill] sm:$0xff] %v982_v50  ;;  %v989_v52 = vld [vmem:[%s852_s24 + $0x168] sm:$0xff]  ;;  %v992_v53 = vld [vmem:[%s852_s24 + $0x170] sm:$0xff]  ;;  %v999_v55 = vsel %vm209_vm0, %v968_v45, 0.0  ;;  %v1003_v56 = vsel %vm209_vm0, %v971_v46, 0.0 }
  0x26   : > { %v220_v23 = vadd.f32 %v219_v14, %v218_v16  ;;  %1662 = vst [vmem:[#allocation13_spill] sm:$0xff] %v986_v51  ;;  %v995_v54 = vld [vmem:[%s852_s24 + $0x178] sm:$0xff]  ;;  %1663 = vst [vmem:[#allocation14_spill] sm:$0xff] %v999_v55  ;;  %v1007_v57 = vsel %vm209_vm0, %v974_v47, 0.0  ;;  %v1010_v58 = vld [vmem:[%s852_s24 + $0x180] sm:$0xff]  ;;  %v1020_v62 = vsel %vm209_vm0, %v989_v52, 0.0 }
  0x27   : > { %1664 = vst [vmem:[#allocation15_spill] sm:$0xff] %v1003_v56  ;;  %1665 = vst [vmem:[#allocation16_spill] sm:$0xff] %v1007_v57  ;;  %v1013_v59 = vld [vmem:[%s852_s24 + $0x188] sm:$0xff]  ;;  %v1016_v60 = vld [vmem:[%s852_s24 + $0x190] sm:$0xff]  ;;  %v1024_v63 = vsel %vm209_vm0, %v992_v53, 0.0  ;;  %v1028_v3 = vsel %vm209_vm0, %v995_v54, 0.0 }
  0x28   : > { %v222_v35 = vadd.f32 %v221_v19, %v220_v23  ;;  %1666 = vst [vmem:[#allocation17_spill] sm:$0xff] %v1020_v62  ;;  %1667 = vst [vmem:[#allocation18_spill] sm:$0xff] %v1024_v63  ;;  %v1031_v4 = vld [vmem:[%s852_s24 + $0x198] sm:$0xff]  ;;  %v1034_v5 = vld [vmem:[%s852_s24 + $0x1a0] sm:$0xff]  ;;  %v1041_v8 = vsel %vm209_vm0, %v1010_v58, 0.0  ;;  %v1045_v10 = vsel %vm209_vm0, %v1013_v59, 0.0 }
  0x29   : > { %1668 = vst [vmem:[#allocation19_spill] sm:$0xff] %v1028_v3  ;;  %v1037_v7 = vld [vmem:[%s852_s24 + $0x1a8] sm:$0xff]  ;;  %1669 = vst [vmem:[#allocation20_spill] sm:$0xff] %v1041_v8  ;;  %v1049_v11 = vsel %vm209_vm0, %v1016_v60, 0.0  ;;  %v1052_v13 = vld [vmem:[%s852_s24 + $0x60] sm:$0xff]  ;;  %s705_s12 = sshll.u32 %s781_s9, 4  ;;  %s706_s12 = int_to_ptr.vmem [resolvable:$false] %s705_s12 }
  0x2a   : > { %v224_v48 = vadd.f32 %v223_v24, %v222_v35  ;;  %1670 = vst [vmem:[#allocation21_spill] sm:$0xff] %v1045_v10  ;;  %1671 = vst [vmem:[#allocation22_spill] sm:$0xff] %v1049_v11  ;;  %v1055_v14 = vld [vmem:[%s852_s24 + $0x1b0] sm:$0xff]  ;;  %v1058_v16 = vld [vmem:[%s852_s24 + $0x1b8] sm:$0xff]  ;;  %v1065_v24 = vsel %vm209_vm0, %v1031_v4, 0.0  ;;  %v1073_v35 = vsel %vm209_vm0, %v1037_v7, 0.0  ;;  %p708_p1 = scmp.lt.s32.totalorder %s1585_s29, %s706_s12 }
  0x2b   : > { %v1061_v19 = vld [vmem:[%s852_s24 + $0x1c0] sm:$0xff]  ;;  %1672 = vst [vmem:[#allocation23_spill] sm:$0xff] %v1065_v24  ;;  %1674 = vst [vmem:[#allocation25_spill] sm:$0xff] %v1073_v35  ;;  %v1079_v11 = vld [vmem:[%s852_s24 + $0x1d0] sm:$0xff]  ;;  %v233_v62 = vsel %vm209_vm0, %v1052_v13, 0.0  ;;  %s707_s13 = scalar_lea.vmem %s706_s12, 64 }
  0x2c   : > { %v226_v61 = vadd.f32 %v225_v25, %v224_v48  ;;  %v1069_v25 = vsel %vm209_vm0, %v1034_v5, 0.0  ;;  %v1076_v48 = vld [vmem:[%s852_s24 + $0x1c8] sm:$0xff]  ;;  %v1082_v10 = vld [vmem:[%s852_s24 + $0x1d8] sm:$0xff]  ;;  %v1097_v35 = vld [vmem:[%s852_s24 + $0x1e0] sm:$0xff]  ;;  %p709_p2 = scmp.lt.s32.totalorder %s707_s13, %s701_s5 }
  0x2d   : > { %1673 = vst [vmem:[#allocation24_spill] sm:$0xff] %v1069_v25  ;;  %v1094_v25 = vsel %vm209_vm0, %v1061_v19, 0.0  ;;  %1678 = vst [vmem:[#allocation29_spill] sm:$0xff] %v1097_v35  ;;  %v1100_v24 = vld [vmem:[%s852_s24 + $0x1e8] sm:$0xff]  ;;  %v1103_v8 = vld [vmem:[%s852_s24 + $0x1f0] sm:$0xff] }
  0x2e   : > { %v228_v23 = vadd.f32 %v227_v29, %v226_v61  ;;  %v1086_v29 = vsel %vm209_vm0, %v1055_v14, 0.0  ;;  %v1090_v61 = vsel %vm209_vm0, %v1058_v16, 0.0  ;;  %1677 = vst [vmem:[#allocation28_spill] sm:$0xff] %v1094_v25  ;;  %1679 = vst [vmem:[#allocation30_spill] sm:$0xff] %v1100_v24  ;;  %v1115_v25 = vsel %vm209_vm0, %v1082_v10, 0.0  ;;  %v1118_v63 = vld [vmem:[%s852_s24 + $0x1f8] sm:$0xff]  ;;  %p710_p3 = por %p709_p2, %p708_p1 }
  0x2f   : > { %1675 = vst [vmem:[#allocation26_spill] sm:$0xff] %v1086_v29  ;;  %1676 = vst [vmem:[#allocation27_spill] sm:$0xff] %v1090_v61  ;;  %v1107_v29 = vsel %vm209_vm0, %v1076_v48, 0.0  ;;  %v1111_v61 = vsel %vm209_vm0, %v1079_v11, 0.0  ;;  %v1138_v57 = vsel %vm209_vm0, %v1118_v63, 0.0  ;;  %v1146_v51 = vld [vmem:[%s852_s24 + $0x80] sm:$0xff] }
  0x30   : > { %1680 = vst [vmem:[#allocation31_spill] sm:$0xff] %v1103_v8  ;;  %v230_v3 = vadd.f32 %v229_v30, %v228_v23  ;;  %1681 = vst [vmem:[#allocation32_spill] sm:$0xff] %v1107_v29  ;;  %v1124_v30 = vsel %vm209_vm0, %v1097_v35, 0.0  ;;  %v1128_v23 = vsel %vm209_vm0, %v1100_v24, 0.0  ;;  %v1149_v50 = vld [vmem:[%s852_s24 + $0x88] sm:$0xff]  ;;  %v241_v43 = vsel %vm209_vm0, %v1146_v51, 0.0  ;;  %p711_p5 = pnand %p710_p3, %p704_p0 }
  0x31   : > { %1682 = vst [vmem:[#allocation33_spill] sm:$0xff] %v1111_v61  ;;  %1683 = vst [vmem:[#allocation34_spill] sm:$0xff] %v1115_v25  ;;  %v1132_v61 = vsel %vm209_vm0, %v1103_v8, 0.0  ;;  %v158_v25 = vld [vmem:[%s852_s24 + $0x68] sm:$0xff]  ;;  %v1175_v42 = vld [vmem:[%s852_s24 + $0xb0] sm:$0xff] }
  0x32   : > { %1684 = vst [vmem:[#allocation35_spill] sm:$0xff] %v1118_v63  ;;  %1685 = vst [vmem:[#allocation36_spill] sm:$0xff] %v1124_v30  ;;  %v232_v29 = vadd.f32 %v923_v31, %v230_v3  ;;  %v235_v56 = vsel %vm209_vm0, %v158_v25, 0.0  ;;  %v159_v30 = vld [vmem:[%s852_s24 + $0x70] sm:$0xff]  ;;  %v343_v31 = vmul.f32 %v855_v0, %v855_v0  ;;  %v344_v3 = vmul.f32 %v858_v1, %v858_v1  ;;  %v1172_v1 = vld [vmem:[%s852_s24 + $0xa8] sm:$0xff] }
  0x33   : > { %1686 = vst [vmem:[#allocation37_spill] sm:$0xff] %v1128_v23  ;;  %1687 = vst [vmem:[#allocation38_spill] sm:$0xff] %v1132_v61  ;;  %v1143_v23 = vld [vmem:[%s852_s24 + $0x78] sm:$0xff]  ;;  %v237_v61 = vsel %vm209_vm0, %v159_v30, 0.0  ;;  %v243_v0 = vsel %vm209_vm0, %v1149_v50, 0.0  ;;  %v1209_v2 = vld [vmem:[%s852_s24 + $0xe0] sm:$0xff] }
  0x34   : > { %1688 = vst [vmem:[#allocation39_spill] sm:$0xff] %v1138_v57  ;;  %v234_v55 = vadd.f32 %v233_v62, %v232_v29  ;;  %1689 = vst [vmem:[#allocation40_spill] sm:$0xff] %v1143_v23  ;;  %v1157_v57 = vld [vmem:[%s852_s24 + $0x90] sm:$0xff]  ;;  %v1160_v62 = vld [vmem:[%s852_s24 + $0x98] sm:$0xff]  ;;  %v239_v44 = vsel %vm209_vm0, %v1143_v23, 0.0 }
  0x35   : > { %1690 = vst [vmem:[#allocation41_spill] sm:$0xff] %v1146_v51  ;;  %1691 = vst [vmem:[#allocation42_spill] sm:$0xff] %v1149_v50  ;;  %v1163_v29 = vld [vmem:[%s852_s24 + $0xa0] sm:$0xff]  ;;  %v1178_v38 = vld [vmem:[%s852_s24 + $0xb8] sm:$0xff] }
  0x36   : > { %1692 = vst [vmem:[#allocation43_spill] sm:$0xff] %v1157_v57  ;;  %1693 = vst [vmem:[#allocation44_spill] sm:$0xff] %v1160_v62  ;;  %v236_v49 = vadd.f32 %v235_v56, %v234_v55  ;;  %v245_v55 = vsel %vm209_vm0, %v1157_v57, 0.0  ;;  %v247_v56 = vsel %vm209_vm0, %v1160_v62, 0.0  ;;  %v249_v37 = vsel %vm209_vm0, %v1163_v29, 0.0  ;;  %v1189_v50 = vld [vmem:[%s852_s24 + $0xc0] sm:$0xff] }
  0x37   : > { %1694 = vst [vmem:[#allocation45_spill] sm:$0xff] %v1163_v29  ;;  %1695 = vst [vmem:[#allocation46_spill] sm:$0xff] %v1172_v1  ;;  %v1192_v51 = vld [vmem:[%s852_s24 + $0xc8] sm:$0xff]  ;;  %v1195_v23 = vld [vmem:[%s852_s24 + $0xd0] sm:$0xff]  ;;  %v251_v57 = vsel %vm209_vm0, %v1172_v1, 0.0  ;;  %v1201_v62 = vsel %vm209_vm0, %v1175_v42, 0.0  ;;  %v346_v29 = vmul.f32 %v870_v6, %v870_v6 }
  0x38   : > { %1696 = vst [vmem:[#allocation47_spill] sm:$0xff] %v1175_v42  ;;  %1697 = vst [vmem:[#allocation48_spill] sm:$0xff] %v1178_v38  ;;  %v238_v63 = vadd.f32 %v237_v61, %v236_v49  ;;  %v1206_v8 = vld [vmem:[%s852_s24 + $0xd8] sm:$0xff]  ;;  %v1213_v24 = vsel %vm209_vm0, %v1178_v38, 0.0  ;;  %v1217_v49 = vsel %vm209_vm0, %v1189_v50, 0.0  ;;  %v1221_v61 = vsel %vm209_vm0, %v1192_v51, 0.0 }
  0x39   : > { %1698 = vst [vmem:[#allocation49_spill] sm:$0xff] %v1189_v50  ;;  %1699 = vst [vmem:[#allocation50_spill] sm:$0xff] %v1192_v51  ;;  %v1225_v42 = vsel %vm209_vm0, %v1195_v23, 0.0  ;;  %v1228_v6 = vld [vmem:[%s852_s24 + $0xe8] sm:$0xff]  ;;  %v1231_v1 = vld [vmem:[%s852_s24 + $0xf0] sm:$0xff]  ;;  %v1235_v38 = vsel %vm209_vm0, %v1206_v8, 0.0  ;;  %v347_v51 = vmul.f32 %v875_v9, %v875_v9  ;;  %v351_v9 = vmul.f32 %v891_v18, %v891_v18 }
  0x3a   : > { %1700 = vst [vmem:[#allocation51_spill] sm:$0xff] %v1195_v23  ;;  %1701 = vst [vmem:[#allocation52_spill] sm:$0xff] %v1206_v8  ;;  %v240_v35 = vadd.f32 %v239_v44, %v238_v63  ;;  %v1239_v50 = vsel %vm209_vm0, %v1209_v2, 0.0  ;;  %v1245_v23 = vsel %vm209_vm0, %v1228_v6, 0.0  ;;  %v348_v44 = vmul.f32 %v880_v12, %v880_v12 }
  0x3b   : > { %1702 = vst [vmem:[#allocation53_spill] sm:$0xff] %v1209_v2  ;;  %1703 = vst [vmem:[#allocation54_spill] sm:$0xff] %v1225_v42  ;;  %v1249_v42 = vsel %vm209_vm0, %v1231_v1, 0.0  ;;  %v349_v63 = vmul.f32 %v885_v15, %v885_v15  ;;  %v350_v2 = vmul.f32 %v888_v17, %v888_v17  ;;  %v355_v12 = vmul.f32 %v1052_v13, %v1052_v13 }
  0x3c   : > { %1704 = vst [vmem:[#allocation55_spill] sm:$0xff] %v1228_v6  ;;  %1705 = vst [vmem:[#allocation56_spill] sm:$0xff] %v1231_v1  ;;  %v242_v8 = vadd.f32 %v241_v43, %v240_v35  ;;  %v352_v6 = vmul.f32 %v896_v20, %v896_v20  ;;  %v353_v1 = vmul.f32 %v899_v21, %v899_v21 }
  0x3d   : > { %1706 = vst [vmem:[#allocation57_spill] sm:$0xff] %v1249_v42  ;;  %v354_v42 = vmul.f32 %v902_v22, %v902_v22  ;;  %v1267_v15 = vmul.f32 %v158_v25, %v158_v25  ;;  %v1269_v35 = vmul.f32 %v159_v30, %v159_v30  ;;  %v376_v17 = vmul.f32 %v909_v26, %v909_v26 }
  0x3e   : > { %v244_v43 = vadd.f32 %v243_v0, %v242_v8  ;;  %v377_v18 = vmul.f32 %v912_v27, %v912_v27  ;;  %v378_v20 = vmul.f32 %v915_v28, %v915_v28  ;;  %v379_v21 = vmul.f32 %v926_v32, %v926_v32 }
  0x3f   : > { %v380_v22 = vmul.f32 %v929_v33, %v929_v33  ;;  %v381_v8 = vmul.f32 %v932_v34, %v932_v34  ;;  %v382_v25 = vmul.f32 %v947_v39, %v947_v39  ;;  %v383_v26 = vmul.f32 %v950_v40, %v950_v40 }
  0x40   : > { %v246_v13 = vadd.f32 %v245_v55, %v244_v43  ;;  %v384_v27 = vmul.f32 %v953_v41, %v953_v41  ;;  %v385_v28 = vmul.f32 %v968_v45, %v968_v45  ;;  %v386_v32 = vmul.f32 %v971_v46, %v971_v46 }
  0x41   : > { %v407_v33 = vsel %vm209_vm0, %v343_v31, 0.0  ;;  %v408_v34 = vsel %vm209_vm0, %v344_v3, 0.0  ;;  %v387_v39 = vmul.f32 %v974_v47, %v974_v47  ;;  %v410_v40 = vsel %vm209_vm0, %v345_v36, 0.0 }
  0x42   : > { %v248_v30 = vadd.f32 %v247_v56, %v246_v13  ;;  %v409_v0 = vadd.f32 %v408_v34, %v407_v33  ;;  %v388_v41 = vmul.f32 %v989_v52, %v989_v52  ;;  %v389_v45 = vmul.f32 %v992_v53, %v992_v53  ;;  %v1707_v13 = vld [vmem:[#allocation29_spill] sm:$0xff]  ;;  %v1708_v33 = vld [vmem:[#allocation30_spill] sm:$0xff]  ;;  %v1709_v34 = vld [vmem:[#allocation31_spill] sm:$0xff] }
  0x43   : > { %v390_v46 = vmul.f32 %v995_v54, %v995_v54  ;;  %v412_v31 = vsel %vm209_vm0, %v346_v29, 0.0  ;;  %v391_v3 = vmul.f32 %v1010_v58, %v1010_v58  ;;  %v392_v47 = vmul.f32 %v1013_v59, %v1013_v59 }
  0x44   : > { %v250_v55 = vadd.f32 %v249_v37, %v248_v30  ;;  %v411_v56 = vadd.f32 %v410_v40, %v409_v0  ;;  %v393_v36 = vmul.f32 %v1016_v60, %v1016_v60  ;;  %v394_v52 = vmul.f32 %v1031_v4, %v1031_v4  ;;  %v1710_v30 = vld [vmem:[#allocation35_spill] sm:$0xff] }
  0x45   : > { %v395_v53 = vmul.f32 %v1034_v5, %v1034_v5  ;;  %v414_v54 = vsel %vm209_vm0, %v347_v51, 0.0  ;;  %v396_v37 = vmul.f32 %v1037_v7, %v1037_v7  ;;  %v397_v58 = vmul.f32 %v1055_v14, %v1055_v14 }
  0x46   : > { %v252_v29 = vadd.f32 %v251_v57, %v250_v55  ;;  %v413_v59 = vadd.f32 %v412_v31, %v411_v56  ;;  %v398_v43 = vmul.f32 %v1058_v16, %v1058_v16  ;;  %v399_v60 = vmul.f32 %v1061_v19, %v1061_v19 }
  0x47   : > { %v400_v4 = vmul.f32 %v1076_v48, %v1076_v48  ;;  %v416_v5 = vsel %vm209_vm0, %v348_v44, 0.0  ;;  %v401_v57 = vmul.f32 %v1079_v11, %v1079_v11  ;;  %v402_v7 = vmul.f32 %v1082_v10, %v1082_v10 }
  0x48   : > { %v254_v51 = vadd.f32 %v1201_v62, %v252_v29  ;;  %v415_v14 = vadd.f32 %v414_v54, %v413_v59  ;;  %v403_v16 = vmul.f32 %v1707_v13, %v1707_v13  ;;  %v404_v19 = vmul.f32 %v1708_v33, %v1708_v33 }
  0x49   : > { %v405_v48 = vmul.f32 %v1709_v34, %v1709_v34  ;;  %v418_v44 = vsel %vm209_vm0, %v349_v63, 0.0  ;;  %v406_v11 = vmul.f32 %v1710_v30, %v1710_v30  ;;  %v420_v10 = vsel %vm209_vm0, %v350_v2, 0.0  ;;  %v1712_v34 = vld [vmem:[#allocation40_spill] sm:$0xff] }
  0x4a   : > { %v256_v62 = vadd.f32 %v1213_v24, %v254_v51  ;;  %v417_v0 = vadd.f32 %v416_v5, %v415_v14  ;;  %v422_v40 = vsel %vm209_vm0, %v351_v9, 0.0  ;;  %v424_v31 = vsel %vm209_vm0, %v352_v6, 0.0 }
  0x4b   : > { %v426_v55 = vsel %vm209_vm0, %v353_v1, 0.0  ;;  %v428_v56 = vsel %vm209_vm0, %v354_v42, 0.0  ;;  %v430_v63 = vsel %vm209_vm0, %v355_v12, 0.0  ;;  %v1350_v24 = vsel %vm209_vm0, %v376_v17, 0.0 }
  0x4c   : > { %v258_v54 = vadd.f32 %v1217_v49, %v256_v62  ;;  %v419_v29 = vadd.f32 %v418_v44, %v417_v0  ;;  %v1353_v59 = vsel %vm209_vm0, %v377_v18, 0.0  ;;  %v1356_v2 = vsel %vm209_vm0, %v378_v20, 0.0  ;;  %v1457_v44 = vld [vmem:[%s852_s24 + $0x100] sm:$0xff] }
  0x4d   : > { %v1359_v6 = vsel %vm209_vm0, %v379_v21, 0.0  ;;  %v1362_v1 = vsel %vm209_vm0, %v380_v22, 0.0  ;;  %v1366_v9 = vsel %vm209_vm0, %v381_v8, 0.0  ;;  %v1369_v12 = vsel %vm209_vm0, %v382_v25, 0.0  ;;  %v1713_v62 = vld [vmem:[#allocation57_spill] sm:$0xff] }
  0x4e   : > { %v260_v42 = vadd.f32 %v1221_v61, %v258_v54  ;;  %v421_v49 = vadd.f32 %v420_v10, %v419_v29  ;;  %v1372_v17 = vsel %vm209_vm0, %v383_v26, 0.0  ;;  %v1375_v18 = vsel %vm209_vm0, %v384_v27, 0.0  ;;  %v1711_v61 = vld [vmem:[#allocation54_spill] sm:$0xff]  ;;  %v1714_v0 = vld [vmem:[#allocation41_spill] sm:$0xff] }
  0x4f   : > { %v1378_v20 = vsel %vm209_vm0, %v385_v28, 0.0  ;;  %v1381_v21 = vsel %vm209_vm0, %v386_v32, 0.0  ;;  %v1385_v8 = vsel %vm209_vm0, %v387_v39, 0.0  ;;  %v1388_v25 = vsel %vm209_vm0, %v388_v41, 0.0 }
  0x50   : > { %v262_v22 = vadd.f32 %v1711_v61, %v260_v42  ;;  %v423_v5 = vadd.f32 %v422_v40, %v421_v49  ;;  %v1391_v26 = vsel %vm209_vm0, %v389_v45, 0.0  ;;  %v1394_v27 = vsel %vm209_vm0, %v390_v46, 0.0  ;;  %v1716_v42 = vld [vmem:[#allocation43_spill] sm:$0xff]  ;;  %v1717_v61 = vld [vmem:[#allocation5_spill] sm:$0xff] }
  0x51   : > { %v1397_v28 = vsel %vm209_vm0, %v391_v3, 0.0  ;;  %v1400_v32 = vsel %vm209_vm0, %v392_v47, 0.0  ;;  %v1404_v14 = vsel %vm209_vm0, %v393_v36, 0.0  ;;  %v1407_v41 = vsel %vm209_vm0, %v394_v52, 0.0 }
  0x52   : > { %v264_v51 = vadd.f32 %v1235_v38, %v262_v22  ;;  %v425_v39 = vadd.f32 %v424_v31, %v423_v5  ;;  %v1410_v45 = vsel %vm209_vm0, %v395_v53, 0.0  ;;  %v1413_v46 = vsel %vm209_vm0, %v396_v37, 0.0 }
  0x53   : > { %v1416_v3 = vsel %vm209_vm0, %v397_v58, 0.0  ;;  %v1419_v47 = vsel %vm209_vm0, %v398_v43, 0.0  ;;  %v1423_v13 = vsel %vm209_vm0, %v399_v60, 0.0  ;;  %v1426_v52 = vsel %vm209_vm0, %v400_v4, 0.0 }
  0x54   : > { %v266_v38 = vadd.f32 %v1239_v50, %v264_v51  ;;  %v427_v36 = vadd.f32 %v426_v55, %v425_v39  ;;  %v1429_v53 = vsel %vm209_vm0, %v401_v57, 0.0  ;;  %v1432_v37 = vsel %vm209_vm0, %v402_v7, 0.0  ;;  %v1441_v50 = vld [vmem:[%s852_s24 + $0xf8] sm:$0xff]  ;;  %v1715_v55 = vld [vmem:[#allocation42_spill] sm:$0xff] }
  0x55   : > { %v1435_v58 = vsel %vm209_vm0, %v403_v16, 0.0  ;;  %v1438_v43 = vsel %vm209_vm0, %v404_v19, 0.0  ;;  %v1445_v4 = vsel %vm209_vm0, %v405_v48, 0.0  ;;  %v1448_v57 = vsel %vm209_vm0, %v406_v11, 0.0  ;;  %v1718_v51 = vld [vmem:[#allocation44_spill] sm:$0xff] }
  0x56   : > { %v268_v60 = vadd.f32 %v1245_v23, %v266_v38  ;;  %v429_v33 = vadd.f32 %v428_v56, %v427_v36  ;;  %v271_v7 = vsel %vm209_vm0, %v1441_v50, 0.0  ;;  %v358_v16 = vmul.f32 %v1712_v34, %v1712_v34  ;;  %v1719_v38 = vld [vmem:[#allocation6_spill] sm:$0xff] }
  0x57   : > { %v432_v19 = vsel %vm209_vm0, %v1267_v15, 0.0  ;;  %v273_v48 = vsel %vm209_vm0, %v1457_v44, 0.0  ;;  %v359_v11 = vmul.f32 %v1714_v0, %v1714_v0  ;;  %v434_v10 = vsel %vm209_vm0, %v1269_v35, 0.0  ;;  %v1723_v0 = vld [vmem:[#allocation8_spill] sm:$0xff] }
  0x58   : > { %v270_v23 = vadd.f32 %v1713_v62, %v268_v60  ;;  %v431_v30 = vadd.f32 %v430_v63, %v429_v33  ;;  %v360_v56 = vmul.f32 %v1715_v55, %v1715_v55  ;;  %v436_v15 = vsel %vm209_vm0, %v358_v16, 0.0  ;;  %v1720_v33 = vld [vmem:[#allocation45_spill] sm:$0xff]  ;;  %v1721_v16 = vld [vmem:[#allocation7_spill] sm:$0xff] }
  0x59   : > { %v361_v63 = vmul.f32 %v1716_v42, %v1716_v42  ;;  %v438_v49 = vsel %vm209_vm0, %v359_v11, 0.0  ;;  %v362_v35 = vmul.f32 %v1718_v51, %v1718_v51 }
  0x5a   : > { %v272_v40 = vadd.f32 %v271_v7, %v270_v23  ;;  %v433_v31 = vadd.f32 %v432_v19, %v431_v30  ;;  %v440_v39 = vsel %vm209_vm0, %v360_v56, 0.0  ;;  %v363_v7 = vmul.f32 %v1720_v33, %v1720_v33  ;;  %v1722_v23 = vld [vmem:[#allocation46_spill] sm:$0xff]  ;;  %v1725_v56 = vld [vmem:[#allocation9_spill] sm:$0xff] }
  0x5b   : > { %v442_v34 = vsel %vm209_vm0, %v361_v63, 0.0  ;;  %v364_v30 = vmul.f32 %v1722_v23, %v1722_v23 }
  0x5c   : > { %v274_v54 = vadd.f32 %v273_v48, %v272_v40  ;;  %v435_v29 = vadd.f32 %v434_v10, %v433_v31  ;;  %v444_v48 = vsel %vm209_vm0, %v362_v35, 0.0  ;;  %v1724_v40 = vld [vmem:[#allocation47_spill] sm:$0xff]  ;;  %v446_v55 = vsel %vm209_vm0, %v363_v7, 0.0 }
  0x5d   : > { %v365_v31 = vmul.f32 %v1724_v40, %v1724_v40  ;;  %v448_v63 = vsel %vm209_vm0, %v364_v30, 0.0 }
  0x5e   : > { %v276_v22 = vadd.f32 %v1717_v61, %v274_v54  ;;  %v437_v5 = vadd.f32 %v436_v15, %v435_v29  ;;  %v1726_v29 = vld [vmem:[#allocation48_spill] sm:$0xff] }
  0x5f   : > { %v366_v42 = vmul.f32 %v1726_v29, %v1726_v29  ;;  %v450_v35 = vsel %vm209_vm0, %v365_v31, 0.0 }
  0x60   : > { %v278_v36 = vadd.f32 %v1719_v38, %v276_v22  ;;  %v439_v60 = vadd.f32 %v438_v49, %v437_v5  ;;  %v1727_v49 = vld [vmem:[#allocation10_spill] sm:$0xff]  ;;  %v1728_v5 = vld [vmem:[#allocation49_spill] sm:$0xff] }
  0x61   : > { %v367_v51 = vmul.f32 %v1728_v5, %v1728_v5  ;;  %v452_v7 = vsel %vm209_vm0, %v366_v42, 0.0 }
  0x62   : > { %v280_v19 = vadd.f32 %v1721_v16, %v278_v36  ;;  %v441_v62 = vadd.f32 %v440_v39, %v439_v60  ;;  %v1729_v39 = vld [vmem:[#allocation11_spill] sm:$0xff]  ;;  %v1730_v60 = vld [vmem:[#allocation50_spill] sm:$0xff] }
  0x63   : > { %v368_v33 = vmul.f32 %v1730_v60, %v1730_v60  ;;  %v454_v30 = vsel %vm209_vm0, %v367_v51, 0.0 }
  0x64   : > { %v282_v11 = vadd.f32 %v1723_v0, %v280_v19  ;;  %v443_v10 = vadd.f32 %v442_v34, %v441_v62  ;;  %v1731_v34 = vld [vmem:[#allocation12_spill] sm:$0xff]  ;;  %v1732_v62 = vld [vmem:[#allocation51_spill] sm:$0xff] }
  0x65   : > { %v369_v23 = vmul.f32 %v1732_v62, %v1732_v62  ;;  %v456_v31 = vsel %vm209_vm0, %v368_v33, 0.0 }
  0x66   : > { %v284_v15 = vadd.f32 %v1725_v56, %v282_v11  ;;  %v445_v54 = vadd.f32 %v444_v48, %v443_v10  ;;  %v1733_v48 = vld [vmem:[#allocation13_spill] sm:$0xff]  ;;  %v1734_v10 = vld [vmem:[#allocation52_spill] sm:$0xff] }
  0x67   : > { %v370_v40 = vmul.f32 %v1734_v10, %v1734_v10  ;;  %v458_v42 = vsel %vm209_vm0, %v369_v23, 0.0  ;;  %v1742_v23 = vld [vmem:[#allocation18_spill] sm:$0xff]  ;;  %v1743_v10 = vld [vmem:[#allocation19_spill] sm:$0xff] }
  0x68   : > { %v286_v61 = vadd.f32 %v1727_v49, %v284_v15  ;;  %v447_v22 = vadd.f32 %v446_v55, %v445_v54  ;;  %v1735_v55 = vld [vmem:[#allocation14_spill] sm:$0xff]  ;;  %v1736_v54 = vld [vmem:[#allocation53_spill] sm:$0xff] }
  0x69   : > { %v371_v29 = vmul.f32 %v1736_v54, %v1736_v54  ;;  %v460_v51 = vsel %vm209_vm0, %v370_v40, 0.0 }
  0x6a   : > { %v288_v38 = vadd.f32 %v1729_v39, %v286_v61  ;;  %v449_v36 = vadd.f32 %v448_v63, %v447_v22  ;;  %v1737_v63 = vld [vmem:[#allocation15_spill] sm:$0xff] }
  0x6b   : > { %v1738_v22 = vld [vmem:[#allocation55_spill] sm:$0xff]  ;;  %v462_v33 = vsel %vm209_vm0, %v371_v29, 0.0  ;;  %v1745_v29 = vld [vmem:[#allocation21_spill] sm:$0xff] }
  0x6c   : > { %v290_v16 = vadd.f32 %v1731_v34, %v288_v38  ;;  %v451_v19 = vadd.f32 %v450_v35, %v449_v36  ;;  %v372_v5 = vmul.f32 %v1738_v22, %v1738_v22  ;;  %v1739_v35 = vld [vmem:[#allocation16_spill] sm:$0xff] }
  0x6d   : > { %v1740_v36 = vld [vmem:[#allocation56_spill] sm:$0xff] }
  0x6e   : > { %v292_v0 = vadd.f32 %v1733_v48, %v290_v16  ;;  %v453_v11 = vadd.f32 %v452_v7, %v451_v19  ;;  %v373_v60 = vmul.f32 %v1740_v36, %v1740_v36  ;;  %v1741_v7 = vld [vmem:[#allocation17_spill] sm:$0xff]  ;;  %v374_v19 = vmul.f32 %v1441_v50, %v1441_v50 }
  0x6f   : > { %v464_v62 = vsel %vm209_vm0, %v372_v5, 0.0  ;;  %v1747_v5 = vld [vmem:[#allocation23_spill] sm:$0xff]  ;;  %v1749_v36 = vld [vmem:[#allocation25_spill] sm:$0xff] }
  0x70   : > { %v294_v56 = vadd.f32 %v1735_v55, %v292_v0  ;;  %v455_v15 = vadd.f32 %v454_v30, %v453_v11  ;;  %v375_v0 = vmul.f32 %v1457_v44, %v1457_v44  ;;  %v466_v11 = vsel %vm209_vm0, %v373_v60, 0.0 }
  0x71   : > { %v468_v55 = vsel %vm209_vm0, %v374_v19, 0.0  ;;  %v1751_v19 = vld [vmem:[#allocation27_spill] sm:$0xff] }
  0x72   : > { %v296_v49 = vadd.f32 %v1737_v63, %v294_v56  ;;  %v457_v61 = vadd.f32 %v456_v31, %v455_v15  ;;  %v1744_v56 = vld [vmem:[#allocation20_spill] sm:$0xff]  ;;  %v470_v50 = vsel %vm209_vm0, %v375_v0, 0.0 }
  0x73   : > { %v1753_v0 = vld [vmem:[#allocation32_spill] sm:$0xff] }
  0x74   : > { %v298_v39 = vadd.f32 %v1739_v35, %v296_v49  ;;  %v459_v38 = vadd.f32 %v458_v42, %v457_v61  ;;  %v1746_v49 = vld [vmem:[#allocation22_spill] sm:$0xff]  ;;  %v1748_v35 = vld [vmem:[#allocation24_spill] sm:$0xff] }
  0x76   : > { %v300_v34 = vadd.f32 %v1741_v7, %v298_v39  ;;  %v461_v16 = vadd.f32 %v460_v51, %v459_v38  ;;  %v1750_v7 = vld [vmem:[#allocation26_spill] sm:$0xff] }
  0x78   : > { %v302_v30 = vadd.f32 %v1742_v23, %v300_v34  ;;  %v463_v48 = vadd.f32 %v462_v33, %v461_v16 }
  0x7a   : > { %v304_v40 = vadd.f32 %v1743_v10, %v302_v30  ;;  %v465_v31 = vadd.f32 %v464_v62, %v463_v48  ;;  %v1752_v30 = vld [vmem:[#allocation28_spill] sm:$0xff]  ;;  %v1754_v10 = vld [vmem:[#allocation33_spill] sm:$0xff] }
  0x7c   : > { %v306_v15 = vadd.f32 %v1744_v56, %v304_v40  ;;  %v467_v54 = vadd.f32 %v466_v11, %v465_v31  ;;  %v1755_v31 = vld [vmem:[#allocation34_spill] sm:$0xff]  ;;  %v1756_v56 = vld [vmem:[#allocation36_spill] sm:$0xff] }
  0x7e   : > { %v308_v42 = vadd.f32 %v1745_v29, %v306_v15  ;;  %v469_v63 = vadd.f32 %v468_v55, %v467_v54  ;;  %v1757_v54 = vld [vmem:[#allocation37_spill] sm:$0xff]  ;;  %v1758_v29 = vld [vmem:[#allocation38_spill] sm:$0xff] }
  0x80   : > { %v310_v61 = vadd.f32 %v1746_v49, %v308_v42  ;;  %v471_v22 = vadd.f32 %v470_v50, %v469_v63  ;;  %v1759_v63 = vld [vmem:[#allocation39_spill] sm:$0xff] }
  0x82   : > { %v312_v44 = vadd.f32 %v1747_v5, %v310_v61  ;;  %v473_v51 = vadd.f32 %v1350_v24, %v471_v22 }
  0x84   : > { %v314_v39 = vadd.f32 %v1748_v35, %v312_v44  ;;  %v475_v38 = vadd.f32 %v1353_v59, %v473_v51 }
  0x86   : > { %v316_v60 = vadd.f32 %v1749_v36, %v314_v39  ;;  %v477_v33 = vadd.f32 %v1356_v2, %v475_v38 }
  0x88   : > { %v318_v34 = vadd.f32 %v1750_v7, %v316_v60  ;;  %v479_v16 = vadd.f32 %v1359_v6, %v477_v33 }
  0x8a   : > { %v320_v62 = vadd.f32 %v1751_v19, %v318_v34  ;;  %v481_v23 = vadd.f32 %v1362_v1, %v479_v16 }
  0x8c   : > { %v322_v48 = vadd.f32 %v1752_v30, %v320_v62  ;;  %v483_v24 = vadd.f32 %v1366_v9, %v481_v23 }
  0x8e   : > { %v324_v11 = vadd.f32 %v1753_v0, %v322_v48  ;;  %v485_v59 = vadd.f32 %v1369_v12, %v483_v24 }
  0x90   : > { %v326_v40 = vadd.f32 %v1754_v10, %v324_v11  ;;  %v487_v2 = vadd.f32 %v1372_v17, %v485_v59 }
  0x92   : > { %v328_v55 = vadd.f32 %v1755_v31, %v326_v40  ;;  %v489_v6 = vadd.f32 %v1375_v18, %v487_v2 }
  0x94   : > { %v330_v15 = vadd.f32 %v1756_v56, %v328_v55  ;;  %v491_v1 = vadd.f32 %v1378_v20, %v489_v6 }
  0x96   : > { %v332_v50 = vadd.f32 %v1757_v54, %v330_v15  ;;  %v493_v9 = vadd.f32 %v1381_v21, %v491_v1 }
  0x98   : > { %v334_v42 = vadd.f32 %v1758_v29, %v332_v50  ;;  %v495_v12 = vadd.f32 %v1385_v8, %v493_v9 }
  0x9a   : > { %v336_v49 = vadd.f32 %v1759_v63, %v334_v42  ;;  %v497_v17 = vadd.f32 %v1388_v25, %v495_v12 }
  0x9c   : > { %v499_v61 = vadd.f32 %v1391_v26, %v497_v17 }
  0x9e   : > { %v501_v18 = vadd.f32 %v1394_v27, %v499_v61 }
  0xa0   : > { %v503_v22 = vadd.f32 %v1397_v28, %v501_v18  ;;  %v337_v28 = vrot.slane %v336_v49, 4 }
  0xa2   : > { %v505_v20 = vadd.f32 %v1400_v32, %v503_v22  ;;  %v338_v35 = vadd.f32 %v337_v28, %v336_v49 }
  0xa4   : > { %v507_v5 = vadd.f32 %v1404_v14, %v505_v20 }
  0xa6   : > { %v509_v21 = vadd.f32 %v1407_v41, %v507_v5 }
  0xa8   : > { %v511_v44 = vadd.f32 %v1410_v45, %v509_v21 }
  0xaa   : > { %v513_v8 = vadd.f32 %v1413_v46, %v511_v44  ;;  %v339_v46 = vrot.slane %v338_v35, 2 }
  0xac   : > { %v515_v51 = vadd.f32 %v1416_v3, %v513_v8 }
  0xae   : > { %v517_v25 = vadd.f32 %v1419_v47, %v515_v51 }
  0xb0   : > { %v519_v26 = vadd.f32 %v1423_v13, %v517_v25  ;;  %v340_v13 = vadd.f32 %v339_v46, %v338_v35 }
  0xb2   : > { %v521_v27 = vadd.f32 %v1426_v52, %v519_v26  ;;  %v341_v38 = vrot.slane %v340_v13, 1 }
  0xb4   : > { %v523_v32 = vadd.f32 %v1429_v53, %v521_v27 }
  0xb6   : > { %v525_v14 = vadd.f32 %v1432_v37, %v523_v32  ;;  %v342_v37 = vadd.f32 %v341_v38, %v340_v13 }
  0xb8   : > { %v527_v41 = vadd.f32 %v1435_v58, %v525_v14 }
  0xba   : > { %v529_v45 = vadd.f32 %v1438_v43, %v527_v41 }
  0xbc   : > { %v531_v3 = vadd.f32 %v1445_v4, %v529_v45 }
  0xbe   : > { %v533_v47 = vadd.f32 %v1448_v57, %v531_v3 }
  0xc0   : > { %v534_v39 = vrot.slane %v533_v47, 4 }
  0xc2   : > { %v535_v52 = vadd.f32 %v534_v39, %v533_v47 }
  0xc4   : > { %v536_v53 = vrot.slane %v535_v52, 2 }
  0xc6   : > { %v537_v36 = vadd.f32 %v536_v53, %v535_v52 }
  0xc8   : > { %v538_v60 = vrot.slane %v537_v36, 1 }
  0xca   : > { %v539_v58 = vadd.f32 %v538_v60, %v537_v36 }
  0xcc   : > { %v541_v43 = vsel %vm540_vm1, %v342_v37, %v539_v58 }
  0xcd   : > { %543 = vst.msk [vmem:[%s134_s28] sm:$0x3] %vm542_vm2, %v541_v43 }
  0xce   : > { %714 = shalt.err (!%p711_p5)
}
  0xcf   : > { %s715_s15 = scalar_lea.hbm %s1583_s3, 32  ;;  %s719_s21 = scalar_lea.hbm %s1631_s1, 64 }
  0xd0   : > { %p716_p6 = scmp.ne.s32.totalorder %s1583_s3, %s715_s15  ;;  %p720_p10 = scmp.lt.u32.totalorder %s1583_s3, %s1631_s1 }
  0xd1   : > { %p721_p11 = scmp.lt.u32.totalorder %s719_s21, %s715_s15  ;;  %p723_p13 = scmp.lt.u32.totalorder %s715_s15, %s1583_s3 }
  0xd2   : > { %p717_p7 = pnand %p716_p6, %p832_p4 }
  0xd3   : > { %p722_p12 = por %p721_p11, %p720_p10 }
  0xd4   : > { %p718_p9 = pneg %p717_p7 }
  0xd5   : > { %p724_p0 = por %p723_p13, %p722_p12 }
  0xd7   : > { %p725_p1 = pnand %p724_p0, %p718_p9 }
  0xd9   : > { %728 = shalt.err (!%p725_p1)
}
  0xda   : > { %646 = dma.vmem_to_hbm [thread:$0]  (%p832_p4), %s1585_s29, 32, %s1583_s3, %s545_s4  }
  0xdb PF: > { %p652_p2 = scmp.ge.s32.totalorder %s779_s11, 2  ;;  %s571_s24 = sand.u32 1, %s759_s6  }
  0xdc   : > { %s572_s25 = scalar_lea.sflag [#allocation3], %s571_s24 }
  0xdd   : > { %p649_p3 = pnand %p652_p2, %p839_p8 }
  0xdf   : > { %754 = dma.done.wait (!%p649_p3), %s572_s25, 32  }
  0xe0   : > { %756 = vsyncadd (!%p649_p3), %s572_s25, 4294967264  ;;  %s14_s11 = sadd.s32 1, %s779_s11   ;;  %s1760_s6 = smov %s763_s7 }
  0xe1   : > { %p11_p5 = scmp.ge.s32.totalorder %s14_s11, 4   ;;  %s1761_s7 = smov %s767_s8 }
  0xe2   : > { %s1762_s8 = smov %s845_s19  ;;  %s1763_s9 = smov %s775_s10 }
  0xe3   : > { %s1764_s10 = smov %s1766_s14  ;;  %13 = sbr.rel (!%p11_p5) target bundleno = 4 (0x4), region = 59 }
  0xea   :  { %577 = vsyncpa [#allocation3], 1 }
  0xeb   :  { %579 = vsyncpa [#allocation3 + $0x1], 1 }

</bundles_post_ra>
